<compile_context>
chip_gen: v7x
topology: tpu7x:2x2x1
jax: 0.10.0
libtpu: 0.0.40
codegen_flags: <defaults>
</compile_context>

<pallas_src>
import functools

import jax
import jax.numpy as jnp
from jax import lax
from jax.experimental import pallas as pl
from jax.experimental.pallas import tpu as pltpu


def _asym_mlp_kernel(x_ref, w0_ref, bw_ref, bo_ref, o_ref,
                     *, alpha, beta, output_act, use_bf16):
    # x_ref : (TILE_B, D)   input tile in natural layout (rows contiguous in HBM)
    # w0_ref: (H, D)        hidden0.weight (PyTorch layout, pinned)
    # bw_ref: (2, H, 1)     [0] = hidden0.bias column, [1] = out.weight column (pinned)
    # bo_ref: (1, 1) SMEM   out.bias scalar
    # o_ref : (1, TILE_B)   lane-dense output slab
    b0_col = bw_ref[0]                                              # (H, 1)
    wo_col = bw_ref[1]                                              # (H, 1)

    # hidden0: contract D (axis 1 of both operands) -> (H, TILE_B), batch on lanes.
    pre = lax.dot_general(w0_ref[...], x_ref[...],
                          dimension_numbers=(((1,), (1,)), ((), ())),
                          preferred_element_type=jnp.float32) + b0_col
    if use_bf16:
        # bf16 EUP tanh path (v6e/v7x); accumulation stays f32.
        h = jnp.tanh(pre.astype(jnp.bfloat16)).astype(jnp.float32)
    else:
        h = jnp.tanh(pre)
    # dropout_prob = 0.0 -> identity (eval semantics), nothing to do.
    # out: Linear(H -> 1) as VPU multiply + cross-sublane (XLU) reduce
    # instead of an N=1 MXU matmul.
    z = jnp.sum(h * wo_col, axis=0, keepdims=True) + bo_ref[0, 0]   # (1, TILE_B)

    c_neg = 1.0 - 2.0 * alpha
    c_pos = 1.0 - 2.0 * beta
    scale = jnp.where(z < 0.0, c_neg, c_pos)
    if output_act == 1:
        o_ref[...] = jnp.tanh(z) * scale
    else:  # output_act == 2 (validated in the wrapper)
        # NOTE: alpha/beta == 0.5 gives inf/nan here, matching the torch module.
        inv_scale = jnp.where(z < 0.0, 1.0 / c_neg, 1.0 / c_pos)
        o_ref[...] = jnp.tanh(z * inv_scale) * scale


def _pick_tile_b(B, tile_b):
    """Batch tile: full array for small B; else 128-lane aligned with >=2 grid steps."""
    if B <= 128:
        return B                                   # single full-array block
    cap = max(128, (pl.cdiv(B, 2) // 128) * 128)   # keep >= 2 steps (v7x megacore)
    t = max(128, min(int(tile_b), cap))
    return (t // 128) * 128


def asymmetric_mlp_forward(x, w0, b0, wo, bo, *, alpha, beta, output_act=1,
                           tile_b=1024, use_bf16=False):
    """Forward pass of AsymmetricMLP.

    x:  (B, D)   input
    w0: (H, D)   hidden0.weight (PyTorch nn.Linear layout)
    b0: (H,)     hidden0.bias
    wo: (1, H)   out.weight
    bo: (1,)     out.bias
    use_bf16: cast x/w0 and the hidden tanh to bf16 (v6e/v7x speed path; keep
              False on v5e or when bit-accuracy vs f32 matters).
    Returns (B, 1) float32.
    """
    if output_act not in (1, 2):
        raise ValueError("Invalid output_mode. Choose 1 or 2.")

    B, D = x.shape
    H = w0.shape[0]
    tile = _pick_tile_b(B, tile_b)
    grid = (pl.cdiv(B, tile),)

    f32 = jnp.float32
    in_dtype = jnp.bfloat16 if use_bf16 else f32
    x_in = x.astype(in_dtype)                     # no pad, no transpose: zero-copy for f32
    w0_in = w0.astype(in_dtype)
    # Pack hidden0.bias and out.weight as two (H, 1) columns in one pinned operand.
    bw = jnp.stack([b0.astype(f32).reshape(H, 1),
                    wo.astype(f32).reshape(H, 1)], axis=0)          # (2, H, 1)
    bo_s = jnp.reshape(bo, (1, 1)).astype(f32)                      # (1, 1) -> SMEM

    kernel = functools.partial(_asym_mlp_kernel,
                               alpha=float(alpha), beta=float(beta),
                               output_act=int(output_act),
                               use_bf16=bool(use_bf16))

    cost = pl.CostEstimate(
        flops=2 * B * D * H + 3 * B * H + 4 * B,
        transcendentals=B * (H + 1),
        bytes_accessed=(B * D * x_in.dtype.itemsize + B * 4
                        + H * D * w0_in.dtype.itemsize + 2 * H * 4),
    )

    out = pl.pallas_call(
        kernel,
        out_shape=jax.ShapeDtypeStruct((1, B), f32),
        grid=grid,
        in_specs=[
            pl.BlockSpec((tile, D), lambda i: (i, 0)),              # x tiles (contiguous rows)
            pl.BlockSpec((H, D), lambda i: (0, 0)),                 # w0 (pinned)
            pl.BlockSpec((2, H, 1), lambda i: (0, 0, 0)),           # [b0 | wo] (pinned)
            pl.BlockSpec(memory_space=pltpu.MemorySpace.SMEM),      # bo scalar
        ],
        out_specs=pl.BlockSpec((1, tile), lambda i: (0, i)),
        compiler_params=pltpu.CompilerParams(
            dimension_semantics=("parallel",)),
        cost_estimate=cost,
    )(x_in, w0_in, bw, bo_s)

    # (1, B) row-major -> (B, 1): pure reshape, no transpose.
    return out.reshape(B, 1)


def _xavier_uniform(key, fan_out, fan_in, dtype=jnp.float32):
    # Matches nn.init.xavier_uniform_ for a Linear weight of shape (fan_out, fan_in).
    bound = (6.0 / (fan_in + fan_out)) ** 0.5
    return jax.random.uniform(key, (fan_out, fan_in), dtype=dtype,
                              minval=-bound, maxval=bound)


def _reference_forward(x, w0, b0, wo, bo, alpha, beta, output_act=1):
    h = jnp.tanh(x @ w0.T + b0)
    z = h @ wo.T + bo
    if output_act == 1:
        t = jnp.tanh(z)
        return jnp.where(z < 0, t * (1 - 2 * alpha), t * (1 - 2 * beta))
    return jnp.where(z < 0,
                     jnp.tanh(z / (1 - 2 * alpha)) * (1 - 2 * alpha),
                     jnp.tanh(z / (1 - 2 * beta)) * (1 - 2 * beta))


if __name__ == "__main__":
    # Small shapes consistent with the module: AsymmetricMLP(input_size=16, hidden_size=32)
    B, D, H = 8, 16, 32
    alpha, beta = 0.1, 0.2

    key = jax.random.PRNGKey(0)
    kx, kw0, kwo = jax.random.split(key, 3)

    x = jax.random.normal(kx, (B, D), dtype=jnp.float32)
    # hidden0: Linear(D -> H): weight (H, D) xavier-uniform, bias zeros
    w0 = _xavier_uniform(kw0, H, D)
    b0 = jnp.zeros((H,), dtype=jnp.float32)
    # out: Linear(H -> 1): weight (1, H) xavier-uniform, bias zeros
    wo = _xavier_uniform(kwo, 1, H)
    bo = jnp.zeros((1,), dtype=jnp.float32)

    # f32 path, both output activations, single full-array block.
    for act in (1, 2):
        out = jax.block_until_ready(
            asymmetric_mlp_forward(x, w0, b0, wo, bo,
                                   alpha=alpha, beta=beta, output_act=act))
        ref = _reference_forward(x, w0, b0, wo, bo, alpha, beta, output_act=act)
        assert out.shape == (B, 1)
        assert jnp.allclose(out, ref, atol=1e-5, rtol=1e-5), f"mismatch output_act={act}"

    # bf16 speed path (v6e/v7x): smoke test (shape + finiteness only).
    out_bf16 = jax.block_until_ready(
        asymmetric_mlp_forward(x, w0, b0, wo, bo,
                               alpha=alpha, beta=beta, output_act=1, use_bf16=True))
    assert out_bf16.shape == (B, 1)
    assert bool(jnp.all(jnp.isfinite(out_bf16)))

    # Multi-step grid with a masked partial last tile (B not a multiple of tile_b).
    B2 = 300
    x2 = jax.random.normal(jax.random.PRNGKey(1), (B2, D), dtype=jnp.float32)
    out2 = jax.block_until_ready(
        asymmetric_mlp_forward(x2, w0, b0, wo, bo,
                               alpha=alpha, beta=beta, output_act=1, tile_b=128))
    ref2 = _reference_forward(x2, w0, b0, wo, bo, alpha, beta, output_act=1)
    assert out2.shape == (B2, 1)
    assert jnp.allclose(out2, ref2, atol=1e-5, rtol=1e-5), "mismatch on partial-tile grid"

    print("KERNEL_OK")
</pallas_src>

<mosaic_0001>
module attributes {stable_mosaic.version = 11 : i64} {
  func.func @_asym_mlp_kernel(%arg0: i32, %arg1: memref<8x16xf32, #tpu.memory_space<vmem>>, %arg2: memref<32x16xf32, #tpu.memory_space<vmem>>, %arg3: memref<2x32x1xf32, #tpu.memory_space<vmem>>, %arg4: memref<1x1xf32, #tpu.memory_space<smem>>, %arg5: memref<1x8xf32, #tpu.memory_space<vmem>>) attributes {dimension_semantics = [#tpu.dimension_semantics<parallel>], iteration_bounds = array<i64: 1>, scalar_prefetch = 0 : i64, scratch_operands = 0 : i64, tpu.core_type = #tpu.core_type<tc>, window_params = [{transform_indices = @transform_0, window_bounds = array<i64: 8, 16>}, {pipeline_mode = #tpu.pipeline_mode<synchronous>, transform_indices = @transform_1, window_bounds = array<i64: 32, 16>}, {pipeline_mode = #tpu.pipeline_mode<synchronous>, transform_indices = @transform_2, window_bounds = array<i64: 2, 32, 1>}, {transform_indices = @transform_3, window_bounds = array<i64: 1, 1>}, {transform_indices = @transform_4, window_bounds = array<i64: 1, 8>}]} {
    %c0 = arith.constant 0 : index
    %c0_0 = arith.constant 0 : index
    %c0_1 = arith.constant 0 : index
    %0 = vector.load %arg3[%c0, %c0_0, %c0_1] : memref<2x32x1xf32, #tpu.memory_space<vmem>>, vector<1x32x1xf32>
    %1 = vector.shape_cast %0 : vector<1x32x1xf32> to vector<32x1xf32>
    %c1 = arith.constant 1 : index
    %c0_2 = arith.constant 0 : index
    %c0_3 = arith.constant 0 : index
    %2 = vector.load %arg3[%c1, %c0_2, %c0_3] : memref<2x32x1xf32, #tpu.memory_space<vmem>>, vector<1x32x1xf32>
    %3 = vector.shape_cast %2 : vector<1x32x1xf32> to vector<32x1xf32>
    %c0_4 = arith.constant 0 : index
    %c0_5 = arith.constant 0 : index
    %4 = vector.load %arg2[%c0_4, %c0_5] : memref<32x16xf32, #tpu.memory_space<vmem>>, vector<32x16xf32>
    %c0_6 = arith.constant 0 : index
    %c0_7 = arith.constant 0 : index
    %5 = vector.load %arg1[%c0_6, %c0_7] : memref<8x16xf32, #tpu.memory_space<vmem>>, vector<8x16xf32>
    %cst = arith.constant dense<0.000000e+00> : vector<32x8xf32>
    %6 = tpu.matmul %4, %5, %cst {dimension_numbers = #tpu.dot_dimension_numbers<[1], [1], [0], [0], [0, 0, 1, 0], [], []>} : vector<32x16xf32>, vector<8x16xf32>, vector<32x8xf32> -> vector<32x8xf32>
    %7 = vector.broadcast %1 : vector<32x1xf32> to vector<32x8xf32>
    %8 = arith.addf %6, %7 : vector<32x8xf32>
    %9 = math.tanh %8 : vector<32x8xf32>
    %10 = vector.broadcast %3 : vector<32x1xf32> to vector<32x8xf32>
    %11 = arith.mulf %9, %10 : vector<32x8xf32>
    %cst_8 = arith.constant dense<0.000000e+00> : vector<8xf32>
    %12 = vector.multi_reduction <add>, %11, %cst_8 [0] : vector<32x8xf32> to vector<8xf32>
    %13 = vector.shape_cast %12 : vector<8xf32> to vector<1x8xf32>
    %c0_9 = arith.constant 0 : index
    %c0_10 = arith.constant 0 : index
    %14 = memref.load %arg4[%c0_9, %c0_10] : memref<1x1xf32, #tpu.memory_space<smem>>
    %15 = vector.broadcast %14 : f32 to vector<1x8xf32>
    %16 = arith.addf %13, %15 : vector<1x8xf32>
    %cst_11 = arith.constant 0.000000e+00 : f32
    %17 = vector.broadcast %cst_11 : f32 to vector<1x8xf32>
    %18 = arith.cmpf olt, %16, %17 : vector<1x8xf32>
    %cst_12 = arith.constant 8.000000e-01 : f32
    %cst_13 = arith.constant 6.000000e-01 : f32
    %19 = vector.broadcast %cst_12 : f32 to vector<1x8xf32>
    %20 = vector.broadcast %cst_13 : f32 to vector<1x8xf32>
    %21 = arith.select %18, %19, %20 : vector<1x8xi1>, vector<1x8xf32>
    %22 = math.tanh %16 : vector<1x8xf32>
    %23 = arith.mulf %22, %21 : vector<1x8xf32>
    %c0_14 = arith.constant 0 : index
    %c0_15 = arith.constant 0 : index
    %24 = vector.load %arg5[%c0_14, %c0_15] : memref<1x8xf32, #tpu.memory_space<vmem>>, vector<1x8xf32>
    tpu.vector_store %arg5[%c0_14, %c0_15], %23 {strides = array<i32>} : memref<1x8xf32, #tpu.memory_space<vmem>>, vector<1x8xf32>,
    return
  }
  func.func @transform_0(%arg0: i32) -> (i32, i32) {
    %c0_i32 = arith.constant 0 : i32
    %c0_i32_0 = arith.constant 0 : i32
    return %arg0, %c0_i32 : i32, i32
  }
  func.func @transform_1(%arg0: i32) -> (i32, i32) {
    %c0_i32 = arith.constant 0 : i32
    %c0_i32_0 = arith.constant 0 : i32
    %c0_i32_1 = arith.constant 0 : i32
    return %c0_i32, %c0_i32_0 : i32, i32
  }
  func.func @transform_2(%arg0: i32) -> (i32, i32, i32) {
    %c0_i32 = arith.constant 0 : i32
    %c0_i32_0 = arith.constant 0 : i32
    %c0_i32_1 = arith.constant 0 : i32
    %c0_i32_2 = arith.constant 0 : i32
    return %c0_i32, %c0_i32_0, %c0_i32_1 : i32, i32, i32
  }
  func.func @transform_3(%arg0: i32) -> (i32, i32) {
    %c0_i32 = arith.constant 0 : i32
    %c0_i32_0 = arith.constant 0 : i32
    %c0_i32_1 = arith.constant 0 : i32
    return %c0_i32, %c0_i32_0 : i32, i32
  }
  func.func @transform_4(%arg0: i32) -> (i32, i32) {
    %c0_i32 = arith.constant 0 : i32
    %c0_i32_0 = arith.constant 0 : i32
    return %c0_i32, %arg0 : i32, i32
  }
}

</mosaic_0001>

<bundles_post_ra>
// kernel: tpu_custom_call.1
= control target key start
LH: loop header
LB: loop body
LE: loop exit
PB: predicated region body
PF: predicated region fallthrough
CT: control target
= control target key end

     0   :  { %vm53_vm0 = vcmask 130048   ;;  %v282_v7 = vmov 0   ;;  %s372_s0 = inlined_call_operand.vmem [shape: f32[8,16], index: 0, kind: input, shape index: {}]   ;;  %s373_s1 = inlined_call_operand.vmem [shape: f32[32,16], index: 1, kind: input, shape index: {}]   ;;  %s374_s2 = inlined_call_operand.vmem [shape: f32[2,32,1], index: 2, kind: input, shape index: {}]   ;;  %s375_s3 = inlined_call_operand.<no memory space> [shape: f32[1,1], index: 3, kind: input, shape index: {}]   ;;  %s376_s4 = inlined_call_operand.hbm [shape: f32[1,8], index: 4, kind: output, shape index: {}]  }
   0x1   :  { %v32_v0 = vld [vmem:[%s372_s0] sm:$0xff]  ;;  %v30_v2 = vld [vmem:[%s373_s1 + $0x10] sm:$0xff]  ;;  %v29_v3 = vld [vmem:[%s373_s1 + $0x8] sm:$0xff]  ;;  %246 = vset.pattern.permute.xlu0 %v282_v7  ;;  %247 = vset.pattern.permute.xlu1 %v282_v7 }
   0x2   :  { %v28_v1 = vld [vmem:[%s373_s1] sm:$0xff]  ;;  %233 = vmatprep.subr.msk.mxu0 %vm53_vm0, %v32_v0  ;;  %241 = vmatprep.subr.msk.mxu1 %vm53_vm0, %v32_v0  ;;  %v31_v4 = vld [vmem:[%s373_s1 + $0x18] sm:$0xff]  ;;  %v21_v6 = vld [vmem:[%s374_s2 + $0x10] sm:$0xff] }
   0x3   :  { %234 = vmatpush3.xpose.msk.msra.mxu0 %vm53_vm0, %v32_v0  ;;  %242 = vmatpush3.xpose.msk.msra.mxu1 %vm53_vm0, %v32_v0  ;;  %v19_v5 = vld [vmem:[%s374_s2] sm:$0xff] }
   0x4   :  { %235 = vmatprep.mubr.msk.f32.mxu0 %vm53_vm0, %v28_v1  ;;  %238 = vmatprep.mubr.msk.f32.mxu1 %vm53_vm0, %v30_v2 }
   0x5   :  { %10 = vsyncpa [#allocation4], 0  ;;  %35 = vperm.xlu0 %246, %v19_v5   ;;  %45 = vperm.xlu1 %247, %v21_v6   ;;  %v20_v8 = vld [vmem:[%s374_s2 + $0x8] sm:$0xff]  ;;  %v22_v9 = vld [vmem:[%s374_s2 + $0x18] sm:$0xff]  ;;  %vm182_vm1 = vcmask 64512   ;;  %v197_v50 = vstv %s375_s3  ;;  %s283_s14 = smov [#allocation3]  }
   0x6   :  { %236 = vmatmul.mubr.msk.f32.vlgmr.msra.gmra.mrb[0].mxu0 %vm53_vm0, %v29_v3  ;;  %239 = vmatmul.mubr.msk.f32.vlgmr.msra.gmra.mrb[0].mxu1 %vm53_vm0, %v31_v4  ;;  %v219_v10 = vld [vmem:[%s374_s2 + $0x20] sm:$0xff]  ;;  %v220_v11 = vld [vmem:[%s374_s2 + $0x28] sm:$0xff]  ;;  %v221_v12 = vld [vmem:[%s374_s2 + $0x30] sm:$0xff]  ;;  %s211_s15 = sshll.u32 %s283_s14, 4  ;;  %v284_v54 = vmov 0.6   ;;  %s212_s15 = int_to_ptr.vmem [resolvable:$true] %s211_s15 }
   0x7   :  { %v222_v13 = vld [vmem:[%s374_s2 + $0x38] sm:$0xff]  ;;  %vm203_vm3 = vcmask 57344   ;;  %s258_s16 = scalar_lea.vmem %s212_s15, 16  ;;  %s262_s17 = scalar_lea.vmem %s212_s15, 32 }
   0x8   :  { %p259_p0 = scmp.ne.s32.totalorder %s212_s15, %s258_s16  ;;  %p263_p1 = scmp.lt.s32.totalorder %s212_s15, %s212_s15 }
   0x9   :  { %40 = vperm.xlu0 %246, %v20_v8   ;;  %50 = vperm.xlu1 %247, %v22_v9   ;;  %p264_p2 = scmp.lt.s32.totalorder %s262_s17, %s258_s16 }
   0xb   :  { %p265_p3 = por %p264_p2, %p263_p1 }
   0xd   :  { %160 = vperm.xlu0 %246, %v219_v10   ;;  %165 = vperm.xlu1 %247, %v220_v11   ;;  %p266_p4 = pnand %p265_p3, %p259_p0 }
  0x11   :  { %170 = vperm.xlu0 %246, %v221_v12   ;;  %175 = vperm.xlu1 %247, %v222_v13  }
  0x84   :  { %v36_v14 = vpop.permute.xlu0 %35  ;;  %v46_v15 = vpop.permute.xlu1 %45 }
  0x88   :  { %v41_v16 = vpop.permute.xlu0 %40  ;;  %v51_v17 = vpop.permute.xlu1 %50 }
  0x8c   :  { %v161_v26 = vpop.permute.xlu0 %160  ;;  %v166_v27 = vpop.permute.xlu1 %165 }
  0x90   :  { %v171_v33 = vpop.permute.xlu0 %170  ;;  %v176_v36 = vpop.permute.xlu1 %175 }
  0xd9   :  { %v237_v18 = vpop.f32.mrb[0].mxu0  ;;  %v240_v19 = vpop.f32.mrb[0].mxu1 }
  0xda   :  { %v141_v20 = vadd.f32 %v237_v18, %v41_v16  ;;  %v151_v21 = vadd.f32 %v240_v19, %v51_v17  ;;  %v135_v22 = vpop.f32.mrb[1].mxu0  ;;  %v145_v23 = vpop.f32.mrb[1].mxu1 }
  0xdb   :  { %v136_v24 = vadd.f32 %v135_v22, %v36_v14  ;;  %v146_v25 = vadd.f32 %v145_v23, %v46_v15 }
  0xdc   :  { %248 = vtanh.f32 %v141_v20 }
  0xdd   :  { %250 = vtanh.f32 %v151_v21 }
  0xde   :  { %252 = vtanh.f32 %v136_v24 }
  0xdf   :  { %254 = vtanh.f32 %v146_v25 }
  0xe6   :  { %v249_v28 = vpop.eup %248 }
  0xe7   :  { %v251_v29 = vpop.eup %250  ;;  %v179_v30 = vmul.f32 %v249_v28, %v166_v27 }
  0xe8   :  { %v253_v31 = vpop.eup %252  ;;  %v181_v38 = vmul.f32 %v251_v29, %v176_v36 }
  0xe9   :  { %v255_v32 = vpop.eup %254  ;;  %v178_v34 = vmul.f32 %v253_v31, %v161_v26  ;;  %v184_v35 = vsel %vm182_vm1, %v179_v30, 0.0 }
  0xea   :  { %v180_v37 = vmul.f32 %v255_v32, %v171_v33  ;;  %v188_v43 = vsel %vm182_vm1, %v181_v38, 0.0 }
  0xeb   :  { %v183_v39 = vsel %vm182_vm1, %v178_v34, 0.0 }
  0xec   :  { %v185_v40 = vadd.f32 %v184_v35, %v183_v39  ;;  %v186_v41 = vsel %vm182_vm1, %v180_v37, 0.0 }
  0xee   :  { %v187_v42 = vadd.f32 %v186_v41, %v185_v40 }
  0xf0   :  { %v189_v44 = vadd.f32 %v188_v43, %v187_v42 }
  0xf2   :  { %v190_v45 = vrot.slane %v189_v44, 4 }
  0xf4   :  { %v191_v46 = vadd.f32 %v190_v45, %v189_v44 }
  0xf6   :  { %v192_v47 = vrot.slane %v191_v46, 2 }
  0xf8   :  { %v193_v48 = vadd.f32 %v192_v47, %v191_v46 }
  0xfa   :  { %v194_v49 = vrot.slane %v193_v48, 1 }
  0xfc   :  { %v195_v51 = vadd.f32 %v194_v49, %v193_v48 }
  0xfe   :  { %v198_v52 = vadd.f32 %v197_v50, %v195_v51 }
 0x100   :  { %256 = vtanh.f32 %v198_v52  ;;  %vm199_vm2 = vcmp.lt.f32.partialorder %v198_v52, 0.0 }
 0x101   :  { %v200_v55 = vsel %vm199_vm2, 0.8, %v284_v54 }
 0x10a   :  { %v257_v53 = vpop.eup %256 }
 0x10b   :  { %v202_v56 = vmul.f32 %v257_v53, %v200_v55 }
 0x10d   :  { %204 = vst.msk [vmem:[#allocation3] sm:$0x1] %vm203_vm3, %v202_v56 }
 0x10e   :  { %269 = shalt.err (!%p266_p4)
}
 0x10f   :  { %s270_s19 = scalar_lea.hbm %s376_s4, 16 }
 0x110   :  { %p271_p5 = scmp.ne.s32.totalorder %s376_s4, %s270_s19  ;;  %p274_p6 = scmp.lt.u32.totalorder %s270_s19, %s376_s4 }
 0x112   :  { %p276_p7 = pnand %p274_p6, %p271_p5 }
 0x114   :  { %279 = shalt.err (!%p276_p7)
}
 0x115   :  { %214 = dma.vmem_to_hbm [thread:$0]  %s212_s15, 16, %s376_s4, [#allocation4]  }
 0x116   :  { %280 = dma.done.wait [#allocation4], 16  }
 0x117   :  { %281 = vsyncadd [#allocation4], 4294967280 }
 0x118   :  { %218 = vsyncpa [#allocation4], 1 }

</bundles_post_ra>
